<compile_context>
chip_gen: v5e
topology: v5e:2x2
jax: 0.10.0
libtpu: 0.0.40
codegen_flags: <defaults>
</compile_context>

<pallas_src>
import functools

import jax
import jax.numpy as jnp
from jax import lax
from jax.experimental import pallas as pl
from jax.experimental.pallas import tpu as pltpu


def _round_up(x, m):
    return ((x + m - 1) // m) * m


def _vmem_budget():
    """Generation-aware VMEM budget (bytes): ~70% of per-core capacity."""
    cap = None
    try:
        info = pltpu.get_tpu_info()
        cap = getattr(info, "vmem_capacity_bytes", None)
    except Exception:
        cap = None
    if not cap:
        cap = 64 * 1024 * 1024  # conservative fallback: v7x per-TC VMEM
    return int(cap * 0.7)


# ---------------------------------------------------------------------------
# Kernels
# ---------------------------------------------------------------------------

def _affine_ws_kernel(x_ref, w_ref, b_ref, o_ref, *, compute_dtype):
    """Weight-stationary: whole (out_dim, feat_dim) W resident in VMEM.

    x_ref : (tm, feat_dim) row tile
    w_ref : (out_dim, feat_dim) full weight (constant index_map -> resident)
    b_ref : (1, out_dim) bias
    o_ref : (tm, out_dim) output row tile
    """
    xt = x_ref[...]
    wt = w_ref[...]
    if compute_dtype is not None:
        xt = xt.astype(compute_dtype)
        wt = wt.astype(compute_dtype)
    acc = lax.dot_general(xt, wt, (((1,), (1,)), ((), ())),
                          preferred_element_type=jnp.float32)
    o_ref[...] = (acc + b_ref[...].astype(jnp.float32)).astype(o_ref.dtype)


def _affine_tiled_kernel(x_ref, w_ref, b_ref, o_ref, acc_ref, *, compute_dtype):
    """General output-stationary GEMM with K innermost.

    x_ref  : (tm, tk)  input tile
    w_ref  : (tn, tk)  weight tile (native layout, contraction on axis 1)
    b_ref  : (1, tn)   bias tile
    o_ref  : (tm, tn)  output tile (resident across K)
    acc_ref: (tm, tn)  f32 accumulator scratch
    """
    k = pl.program_id(2)

    @pl.when(k == 0)
    def _():
        # Fold the bias into the accumulator init (removes a finalize-path add).
        acc_ref[...] = jnp.broadcast_to(
            b_ref[...].astype(jnp.float32), acc_ref.shape)

    xt = x_ref[...]
    wt = w_ref[...]
    if compute_dtype is not None:
        xt = xt.astype(compute_dtype)
        wt = wt.astype(compute_dtype)
    acc_ref[...] += lax.dot_general(xt, wt, (((1,), (1,)), ((), ())),
                                    preferred_element_type=jnp.float32)

    @pl.when(k == pl.num_programs(2) - 1)
    def _():
        o_ref[...] = acc_ref[...].astype(o_ref.dtype)


# ---------------------------------------------------------------------------
# Tile planning / launchers
# ---------------------------------------------------------------------------

def _ws_plan(n_rows, feat_dim, out_dim, x_dtype, w_dtype, budget):
    """Return (tm, rows_p) for the weight-stationary path, or None if W does
    not fit the VMEM budget."""
    xisz = jnp.dtype(x_dtype).itemsize
    wisz = jnp.dtype(w_dtype).itemsize
    sub = max(8, 32 // xisz)  # sublane minimum: 8 f32, 16 bf16, 32 int8

    w_bytes = 2 * out_dim * feat_dim * wisz  # conservatively double-buffered
    if w_bytes > budget:
        return None

    # Row tile: prefer >= 2 row blocks (v7x megacore) without introducing
    # a row-padding copy; otherwise a single full-dim block (legal, no pad).
    if n_rows <= 512:
        if n_rows >= 2 * sub and n_rows % (2 * sub) == 0:
            tm = n_rows // 2
        else:
            tm = n_rows
    else:
        tm = 512

    def need(tm_):
        return (w_bytes
                + 2 * tm_ * feat_dim * xisz      # x tiles (double-buffered)
                + 2 * tm_ * out_dim * xisz       # out tiles (double-buffered)
                + 2 * out_dim * wisz)            # bias

    while need(tm) > budget and tm > sub:
        tm = max(sub, (tm // 2) // sub * sub)
    if need(tm) > budget:
        return None

    rows_p = n_rows if tm == n_rows else _round_up(n_rows, tm)
    return tm, rows_p


def _run_ws(x2d, weight, b2d, out_dtype, compute_dtype, tm, rows_p, budget):
    n_rows, feat_dim = x2d.shape
    out_dim = weight.shape[0]
    if rows_p != n_rows:  # pad only if the row tiling actually needs it
        x2d = jnp.pad(x2d, ((0, rows_p - n_rows), (0, 0)))

    kernel = functools.partial(_affine_ws_kernel, compute_dtype=compute_dtype)
    cost = pl.CostEstimate(
        flops=2 * rows_p * feat_dim * out_dim,
        transcendentals=0,
        bytes_accessed=(x2d.size * x2d.dtype.itemsize
                        + weight.size * weight.dtype.itemsize
                        + b2d.size * b2d.dtype.itemsize
                        + rows_p * out_dim * jnp.dtype(out_dtype).itemsize),
    )

    out2d = pl.pallas_call(
        kernel,
        out_shape=jax.ShapeDtypeStruct((rows_p, out_dim), out_dtype),
        grid_spec=pltpu.PrefetchScalarGridSpec(
            num_scalar_prefetch=0,
            grid=(rows_p // tm,),
            in_specs=[
                pl.BlockSpec((tm, feat_dim), lambda i: (i, 0)),       # x rows
                pl.BlockSpec((out_dim, feat_dim), lambda i: (0, 0)),  # W resident
                pl.BlockSpec((1, out_dim), lambda i: (0, 0)),         # bias resident
            ],
            out_specs=pl.BlockSpec((tm, out_dim), lambda i: (i, 0)),
        ),
        compiler_params=pltpu.CompilerParams(
            dimension_semantics=("parallel",),
            vmem_limit_bytes=budget),
        cost_estimate=cost,
    )(x2d, weight, b2d)
    return out2d[:n_rows]


def _run_general(x2d, weight, b2d, out_dtype, compute_dtype, budget, tile_caps):
    n_rows, feat_dim = x2d.shape
    out_dim = weight.shape[0]
    xisz = x2d.dtype.itemsize
    wisz = weight.dtype.itemsize
    sub = max(8, 32 // xisz)

    tm_cap, tn_cap, tk_cap = tile_caps
    tm = min(tm_cap, _round_up(n_rows, sub))
    tn = min(tn_cap, _round_up(out_dim, 128))
    tk = min(tk_cap, _round_up(feat_dim, 128))

    def need(tm_, tn_, tk_):
        return (2 * (tm_ * tk_ * xisz + tn_ * tk_ * wisz + tn_ * wisz)
                + 2 * tm_ * tn_ * xisz
                + tm_ * tn_ * 4)

    # Shrink (largest axis first) until the tile plan fits the VMEM budget,
    # keeping every tile layout-legal (multiples of 128 / sublane minimum).
    while need(tm, tn, tk) > budget:
        if tk >= max(tm, tn) and tk > 128:
            tk = max(128, (tk // 2) // 128 * 128)
        elif tn >= tm and tn > 128:
            tn = max(128, (tn // 2) // 128 * 128)
        elif tm > sub:
            tm = max(sub, (tm // 2) // sub * sub)
        else:
            break

    rows_p = _round_up(n_rows, tm)
    feat_p = _round_up(feat_dim, tk)
    out_p = _round_up(out_dim, tn)

    # Pad only the axes that actually need it (avoid HBM copies when aligned).
    if rows_p != n_rows or feat_p != feat_dim:
        x2d = jnp.pad(x2d, ((0, rows_p - n_rows), (0, feat_p - feat_dim)))
    w = weight
    if out_p != out_dim or feat_p != feat_dim:
        w = jnp.pad(weight, ((0, out_p - out_dim), (0, feat_p - feat_dim)))
    b = b2d
    if out_p != out_dim:
        b = jnp.pad(b2d, ((0, 0), (0, out_p - out_dim)))

    grid = (rows_p // tm, out_p // tn, feat_p // tk)
    kernel = functools.partial(_affine_tiled_kernel, compute_dtype=compute_dtype)
    cost = pl.CostEstimate(
        flops=2 * rows_p * feat_p * out_p,
        transcendentals=0,
        bytes_accessed=(x2d.size * xisz + w.size * wisz
                        + b.size * b.dtype.itemsize
                        + rows_p * out_p * jnp.dtype(out_dtype).itemsize),
    )

    out2d = pl.pallas_call(
        kernel,
        out_shape=jax.ShapeDtypeStruct((rows_p, out_p), out_dtype),
        grid_spec=pltpu.PrefetchScalarGridSpec(
            num_scalar_prefetch=0,
            grid=grid,
            in_specs=[
                pl.BlockSpec((tm, tk), lambda i, j, k: (i, k)),   # x tile
                pl.BlockSpec((tn, tk), lambda i, j, k: (j, k)),   # W tile (native)
                pl.BlockSpec((1, tn), lambda i, j, k: (0, j)),    # bias tile
            ],
            out_specs=pl.BlockSpec((tm, tn), lambda i, j, k: (i, j)),
            scratch_shapes=[pltpu.VMEM((tm, tn), jnp.float32)],
        ),
        compiler_params=pltpu.CompilerParams(
            dimension_semantics=("parallel", "parallel", "arbitrary"),
            vmem_limit_bytes=budget),
        cost_estimate=cost,
    )(x2d, w, b)
    return out2d[:n_rows, :out_dim]


# ---------------------------------------------------------------------------
# Public forward
# ---------------------------------------------------------------------------

def natural_affine_transform(x, weight, bias=None, *, compute_dtype=None,
                             _force_general=False,
                             _tile_caps=(512, 512, 1024)):
    """Forward of NaturalAffineTransform: y = x @ weight.T + bias.

    x:      (..., feat_dim)
    weight: (out_dim, feat_dim)   (kept in native layout, never transposed)
    bias:   (1, out_dim) or None
    compute_dtype: optional dtype (e.g. jnp.bfloat16) for the MXU operands;
                   accumulation stays f32.
    returns (..., out_dim)
    """
    out_dim, feat_dim = weight.shape
    orig_shape = x.shape
    x2d = x.reshape(-1, feat_dim)
    n_rows = x2d.shape[0]
    out_dtype = x.dtype

    # Tiny problems: XLA's fused dot beats pallas_call fixed cost.
    if (not _force_general) and (feat_dim < 128 or out_dim < 128 or n_rows < 8):
        y = jnp.dot(x2d, weight.T, preferred_element_type=jnp.float32)
        if bias is not None:
            y = y + bias.reshape(1, out_dim).astype(jnp.float32)
        return y.astype(out_dtype).reshape(*orig_shape[:-1], out_dim)

    budget = _vmem_budget()
    if bias is None:
        b2d = jnp.zeros((1, out_dim), weight.dtype)
    else:
        b2d = bias.reshape(1, out_dim)

    if not _force_general:
        plan = _ws_plan(n_rows, feat_dim, out_dim, x.dtype, weight.dtype, budget)
        if plan is not None:
            tm, rows_p = plan
            out2d = _run_ws(x2d, weight, b2d, out_dtype, compute_dtype,
                            tm, rows_p, budget)
            return out2d.reshape(*orig_shape[:-1], out_dim)

    out2d = _run_general(x2d, weight, b2d, out_dtype, compute_dtype,
                         budget, _tile_caps)
    return out2d.reshape(*orig_shape[:-1], out_dim)


def init_parameters(key, feat_dim, out_dim, dtype=jnp.float32):
    """Matches NaturalAffineTransform.init_parameters():
       weight ~ N(0,1) * 1/sqrt(feat_dim*out_dim), bias ~ N(0,1)."""
    kw, kb = jax.random.split(key)
    weight = jax.random.normal(kw, (out_dim, feat_dim), dtype) * (
        1.0 / (feat_dim * out_dim) ** 0.5)
    bias = jax.random.normal(kb, (1, out_dim), dtype)
    return weight, bias


# TODO(synk): OnlineNaturalGradient preconditioner state (alpha,
# num_samples_history, update_period) only affects the backward/update path in
# Kaldi; it has no forward-pass equivalent, so it is intentionally not modeled.

if __name__ == "__main__":
    key = jax.random.PRNGKey(0)
    k_x, k_p = jax.random.split(key)

    batch, seq, feat_dim, out_dim = 2, 8, 256, 384
    x = jax.random.normal(k_x, (batch, seq, feat_dim), jnp.float32)
    weight, bias = init_parameters(k_p, feat_dim, out_dim)
    y_ref = x @ weight.T + bias

    # 1) Weight-stationary fast path (whole W resident in VMEM).
    y = jax.block_until_ready(natural_affine_transform(x, weight, bias))
    assert y.shape == (batch, seq, out_dim)
    assert jnp.allclose(y, y_ref, atol=1e-4, rtol=1e-4)

    # 2) Ragged rows / no-bias configuration (full-dim row block, no padding).
    x2 = jax.random.normal(k_x, (3, 5, feat_dim), jnp.float32)
    y2 = jax.block_until_ready(natural_affine_transform(x2, weight, None))
    assert jnp.allclose(y2, x2 @ weight.T, atol=1e-4, rtol=1e-4)

    # 3) General K-tiled accumulator path (forced with tiny tile caps so it
    #    gets exercised at these small demo shapes).
    y3 = jax.block_until_ready(
        natural_affine_transform(x, weight, bias,
                                 _force_general=True, _tile_caps=(8, 128, 128)))
    assert jnp.allclose(y3, y_ref, atol=1e-4, rtol=1e-4)

    # 4) Optional bf16-on-MXU operands (f32 accumulation) — relaxed tolerance.
    y4 = jax.block_until_ready(
        natural_affine_transform(x, weight, bias, compute_dtype=jnp.bfloat16))
    assert jnp.allclose(y4, y_ref, atol=5e-2, rtol=5e-2)

    # 5) Tiny-problem fallback (below MXU-friendly sizes -> plain XLA dot).
    xs = jax.random.normal(k_x, (2, 8, 32), jnp.float32)
    ws, bs = init_parameters(k_p, 32, 64)
    y5 = jax.block_until_ready(natural_affine_transform(xs, ws, bs))
    assert jnp.allclose(y5, xs @ ws.T + bs, atol=1e-5, rtol=1e-5)

    print("KERNEL_OK")
</pallas_src>

<mosaic_0001>
module attributes {stable_mosaic.version = 11 : i64} {
  func.func @_affine_ws_kernel(%arg0: i32, %arg1: memref<8x256xf32, #tpu.memory_space<vmem>>, %arg2: memref<384x256xf32, #tpu.memory_space<vmem>>, %arg3: memref<1x384xf32, #tpu.memory_space<vmem>>, %arg4: memref<8x384xf32, #tpu.memory_space<vmem>>) attributes {dimension_semantics = [#tpu.dimension_semantics<parallel>], iteration_bounds = array<i64: 2>, scalar_prefetch = 0 : i64, scratch_operands = 0 : i64, tpu.core_type = #tpu.core_type<tc>, window_params = [{transform_indices = @transform_0, window_bounds = array<i64: 8, 256>}, {pipeline_mode = #tpu.pipeline_mode<synchronous>, transform_indices = @transform_1, window_bounds = array<i64: 384, 256>}, {pipeline_mode = #tpu.pipeline_mode<synchronous>, transform_indices = @transform_2, window_bounds = array<i64: 1, 384>}, {transform_indices = @transform_3, window_bounds = array<i64: 8, 384>}]} {
    %c0 = arith.constant 0 : index
    %c0_0 = arith.constant 0 : index
    %0 = vector.load %arg1[%c0, %c0_0] : memref<8x256xf32, #tpu.memory_space<vmem>>, vector<8x256xf32>
    %c0_1 = arith.constant 0 : index
    %c0_2 = arith.constant 0 : index
    %1 = vector.load %arg2[%c0_1, %c0_2] : memref<384x256xf32, #tpu.memory_space<vmem>>, vector<384x256xf32>
    %cst = arith.constant dense<0.000000e+00> : vector<8x384xf32>
    %2 = tpu.matmul %0, %1, %cst {dimension_numbers = #tpu.dot_dimension_numbers<[1], [1], [0], [0], [0, 0, 1, 0], [], []>} : vector<8x256xf32>, vector<384x256xf32>, vector<8x384xf32> -> vector<8x384xf32>
    %c0_3 = arith.constant 0 : index
    %c0_4 = arith.constant 0 : index
    %3 = vector.load %arg3[%c0_3, %c0_4] : memref<1x384xf32, #tpu.memory_space<vmem>>, vector<1x384xf32>
    %4 = vector.broadcast %3 : vector<1x384xf32> to vector<8x384xf32>
    %5 = arith.addf %2, %4 : vector<8x384xf32>
    %c0_5 = arith.constant 0 : index
    %c0_6 = arith.constant 0 : index
    %6 = vector.load %arg4[%c0_5, %c0_6] : memref<8x384xf32, #tpu.memory_space<vmem>>, vector<8x384xf32>
    tpu.vector_store %arg4[%c0_5, %c0_6], %5 {strides = array<i32>} : memref<8x384xf32, #tpu.memory_space<vmem>>, vector<8x384xf32>,
    return
  }
  func.func @transform_0(%arg0: i32) -> (i32, i32) {
    %c0_i32 = arith.constant 0 : i32
    %c0_i32_0 = arith.constant 0 : i32
    return %arg0, %c0_i32 : i32, i32
  }
  func.func @transform_1(%arg0: i32) -> (i32, i32) {
    %c0_i32 = arith.constant 0 : i32
    %c0_i32_0 = arith.constant 0 : i32
    %c0_i32_1 = arith.constant 0 : i32
    return %c0_i32, %c0_i32_0 : i32, i32
  }
  func.func @transform_2(%arg0: i32) -> (i32, i32) {
    %c0_i32 = arith.constant 0 : i32
    %c0_i32_0 = arith.constant 0 : i32
    %c0_i32_1 = arith.constant 0 : i32
    return %c0_i32, %c0_i32_0 : i32, i32
  }
  func.func @transform_3(%arg0: i32) -> (i32, i32) {
    %c0_i32 = arith.constant 0 : i32
    %c0_i32_0 = arith.constant 0 : i32
    return %arg0, %c0_i32 : i32, i32
  }
}

</mosaic_0001>

<bundles_post_ra>
// kernel: tpu_custom_call.1
= control target key start
LH: loop header
LB: loop body
LE: loop exit
PB: predicated region body
PF: predicated region fallthrough
CT: control target
= control target key end

     0   :  { %8 = vsyncpa [#allocation3], 0  ;;  %s978_s0 = inlined_call_operand.hbm [shape: f32[16,256], index: 0, kind: input, shape index: {}]   ;;  %s979_s1 = inlined_call_operand.hbm [shape: f32[384,256], index: 1, kind: input, shape index: {}]   ;;  %s980_s2 = inlined_call_operand.hbm [shape: f32[1,384], index: 2, kind: input, shape index: {}]   ;;  %s981_s3 = inlined_call_operand.hbm [shape: f32[16,384], index: 3, kind: output, shape index: {}]  }
   0x1   :  { %10 = vsyncpa [#allocation3 + $0x1], 0 }
   0x2   :  { %11 = vsyncpa [#allocation6], 0 }
   0x3   :  { %12 = vsyncpa [#allocation4], 0 }
   0x4   :  { %14 = vsyncpa [#allocation4 + $0x1], 0  ;;  %s828_s12 = smov 0   ;;  %s830_s13 = smov 0  }
   0x5   :  { %s832_s14 = smov 0   ;;  %s834_s15 = smov 0  }
   0x6 LB: > { %s130_s18 = sshll.u32 %s979_s1, 4  ;;  %s852_s19 = sadd.s32 4294967295, %s802_s15   ;;  %s802_s15 = sphi %s834_s15, %s992_s15   ;;  %s798_s14 = sphi %s832_s14, %s991_s14   ;;  %s794_s13 = sphi %s830_s13, %s990_s13   ;;  %s790_s12 = sphi %s828_s12, %s989_s12   ;;  %s131_s18 = int_to_ptr.hbm [resolvable:$true] %s130_s18 }
   0x7   : > { %p556_p0 = scmp.ge.s32.totalorder %s802_s15, 1  ;;  %p41_p1 = scmp.eq.s32.totalorder %s852_s19, 0 }
   0x8   : > { %p119_p2 = scmp.lt.s32.totalorder %s802_s15, 3  ;;  %s804_s21 = smov [#allocation5]  }
   0x9   : > { %s132_s22 = sshll.u32 %s804_s21, 4  ;;  %s145_s25 = sshll.u32 %s980_s2, 4  ;;  %s133_s22 = int_to_ptr.vmem [resolvable:$true] %s132_s22  ;;  %s146_s25 = int_to_ptr.hbm [resolvable:$true] %s145_s25 }
   0xa   : > { %p857_p3 = pnand %p556_p0, %p119_p2  ;;  %s805_s26 = smov [#allocation7]  }
   0xb   : > { %s147_s27 = sshll.u32 %s805_s26, 4  ;;  %s806_s28 = smov 256   ;;  %s148_s27 = int_to_ptr.vmem [resolvable:$true] %s147_s27 }
   0xc   : > { %p585_p4 = pneg %p857_p3  ;;  %s807_s29 = smov 16  }
   0xd   : > { %s555_s30 = sadd.s32 4294967294, %s802_s15   ;;  %s871_s4 = sadd.s32 1, %s802_s15  }
   0xe   : > { %p586_p6 = pnand %p585_p4, %p41_p1  ;;  %s24_s5 = ssub.s32 %s802_s15, %s871_s4 }
   0xf   : > { %s27_s6 = sadd.s32 1, %s798_s14  ;;  %p25_p7 = scmp.eq.s32.totalorder %s24_s5, 0 }
  0x10   : > { %588 = dma.hbm_to_vmem [thread:$0]  (!%p586_p6), %s131_s18, 12288, %s133_s22, [#allocation6], %s806_s28, %s806_s28, %s807_s29  }
  0x11   : > { %591 = dma.hbm_to_vmem [thread:$0]  (!%p586_p6), %s146_s25, 48, %s148_s27, [#allocation6]  }
  0x12   : > { %p34_p8 = scmp.ne.s32.totalorder %s798_s14, %s794_s13  ;;  %p35_p9 = scmp.eq.s32.totalorder %s802_s15, 0 }
  0x13   : > { %p40_p10 = scmp.ne.s32.totalorder %s794_s13, %s790_s12  ;;  %p106_p13 = scmp.eq.s32.totalorder %s852_s19, 1 }
  0x14   : > { %s882_s7 = scalar_select %p25_p7, %s798_s14, %s27_s6  }
  0x15   : > { %p884_p11 = por %p35_p9, %p34_p8  ;;  %p890_p12 = por %p41_p1, %p40_p10 }
  0x16   : > { %p112_p0 = scmp.eq.s32.totalorder %s555_s30, 1  ;;  %p602_p2 = scmp.lt.s32.totalorder %s802_s15, 2 }
  0x17   : > { %s158_s10 = sand.u32 1, %s798_s14   ;;  %p897_p4 = por %p106_p13, %p34_p8 }
  0x18   : > { %p901_p6 = por %p112_p0, %p40_p10  ;;  %s560_s17 = sshll.u32 %s158_s10, 4 }
  0x19   : > { %s570_s18 = sshll.u32 %s802_s15, 4  ;;  %s162_s24 = scalar_lea.vmem [#allocation2], %s560_s17 }
  0x1a   : > { %s167_s23 = scalar_lea.hbm %s978_s0, %s570_s18  ;;  %s171_s25 = sshll.u32 %s162_s24, 4  ;;  %s172_s25 = int_to_ptr.vmem [resolvable:$true] %s171_s25 }
  0x1b   : > { %s169_s26 = sshll.u32 %s167_s23, 4  ;;  %p911_p7 = pnand %p602_p2, %p884_p11  ;;  %s170_s26 = int_to_ptr.hbm [resolvable:$true] %s169_s26 }
  0x1c   : > { %s159_s28 = scalar_lea.sflag [#allocation3], %s158_s10  ;;  %s702_s29 = sshra.s32 %s170_s26, 4  ;;  %s703_s29 = int_to_ptr.hbm [resolvable:$true] %s702_s29 }
  0x1d   : > { %s704_s30 = scalar_lea.hbm %s703_s29, 16  ;;  %p706_p9 = pneg %p911_p7 }
  0x1e   : > { %p705_p8 = scmp.ne.s32.totalorder %s703_s29, %s704_s30  ;;  %s709_s17 = scalar_lea.hbm %s978_s0, 32 }
  0x1f   : > { %p710_p11 = scmp.lt.s32.totalorder %s703_s29, %s978_s0  ;;  %p711_p0 = scmp.lt.s32.totalorder %s709_s17, %s704_s30 }
  0x20   : > { %p707_p10 = pnand %p706_p9, %p705_p8 }
  0x21   : > { %p712_p2 = por %p711_p0, %p710_p11 }
  0x22   : > { %p708_p13 = pneg %p707_p10 }
  0x24   : > { %p713_p5 = pnand %p712_p2, %p708_p13 }
  0x26   : > { %716 = shalt.err (!%p713_p5)
}
  0x27   : > { %595 = dma.hbm_to_vmem [thread:$0]  (!%p911_p7), %s170_s26, 256, %s172_s25, %s159_s28  }
  0x28   : > { %180 = sbr.rel (%p857_p3) target bundleno = 309 (0x135), region = 32  ;;  %s928_s10 = sand.u32 (!%p857_p3), 1, %s794_s13  }
  0x29   : > { %s564_s21 = sshll.u32 (!%p857_p3), %s928_s10, 4  ;;  %s183_s22 = scalar_lea.sflag (!%p857_p3), [#allocation3], %s928_s10 }
  0x2a   : > { %s932_s23 = scalar_lea.vmem (!%p857_p3), [#allocation2], %s564_s21 }
  0x2d   : > { %777 = dma.done.wait (%p890_p12), %s183_s22, 256  }
  0x2e   : > { %779 = vsyncadd (%p890_p12), %s183_s22, 4294967040 }
  0x2f   : > { %781 = dma.done.wait (%p41_p1), [#allocation6], 12336  }
  0x30   : > { %783 = vsyncadd (%p41_p1), [#allocation6], 4294954960  ;;  %v252_v0 = vld [vmem:[#allocation5 + $0xf0] sm:$0xff]  ;;  %v253_v1 = vld [vmem:[#allocation5 + $0xf8] sm:$0xff]  ;;  %s571_s20 = smul.u32 24, %s928_s10  ;;  %s450_s30 = scalar_lea.sflag [#allocation4], %s928_s10 }
  0x31   : > { %326 = vmatpush.xpose.msra.mxu0 %v252_v0  ;;  %346 = vmatpush.xpose.msra.mxu1 %v253_v1  ;;  %v250_v2 = vld [vmem:[#allocation5 + $0xe0] sm:$0xff]  ;;  %v251_v3 = vld [vmem:[#allocation5 + $0xe8] sm:$0xff]  ;;  %v248_v4 = vld [vmem:[#allocation5 + $0xd0] sm:$0xff]  ;;  %s572_s24 = smul.u32 24, %s852_s19  ;;  %s752_s18 = scalar_lea.hbm %s981_s3, 48 }
  0x32   : > { %v249_v5 = vld [vmem:[#allocation5 + $0xd8] sm:$0xff]  ;;  %v246_v6 = vld [vmem:[#allocation5 + $0xc0] sm:$0xff]  ;;  %v247_v7 = vld [vmem:[#allocation5 + $0xc8] sm:$0xff]  ;;  %s219_s9 = scalar_lea.vmem [#allocation8], %s571_s20 }
  0x33   : > { %v244_v8 = vld [vmem:[#allocation5 + $0xb0] sm:$0xff]  ;;  %v245_v9 = vld [vmem:[#allocation5 + $0xb8] sm:$0xff]  ;;  %v242_v10 = vld [vmem:[#allocation5 + $0xa0] sm:$0xff]  ;;  %s461_s27 = scalar_lea.hbm %s981_s3, %s572_s24  ;;  %s463_s28 = sshll.u32 %s219_s9, 4  ;;  %s464_s28 = int_to_ptr.vmem [resolvable:$true] %s463_s28 }
  0x34   : > { %v243_v11 = vld [vmem:[#allocation5 + $0xa8] sm:$0xff]  ;;  %v284_v12 = vld [vmem:[#allocation5 + $0x1f0] sm:$0xff]  ;;  %v241_v14 = vld [vmem:[#allocation5 + $0x98] sm:$0xff]  ;;  %s465_s29 = sshll.u32 %s461_s27, 4  ;;  %s466_s29 = int_to_ptr.hbm [resolvable:$true] %s465_s29 }
  0x35   : > { %327 = vmatpush.xpose.msra.mxu0 %v250_v2  ;;  %347 = vmatpush.xpose.msra.mxu1 %v251_v3  ;;  %v240_v13 = vld [vmem:[#allocation5 + $0x90] sm:$0xff]  ;;  %v285_v15 = vld [vmem:[#allocation5 + $0x1f8] sm:$0xff]  ;;  %v282_v16 = vld [vmem:[#allocation5 + $0x1e0] sm:$0xff]  ;;  %s746_s5 = sshra.s32 %s466_s29, 4  ;;  %s747_s5 = int_to_ptr.hbm [resolvable:$true] %s746_s5 }
  0x36   : > { %366 = vmatpush.xpose.msra.mxu2 %v284_v12  ;;  %v238_v17 = vld [vmem:[#allocation5 + $0x80] sm:$0xff]  ;;  %v239_v18 = vld [vmem:[#allocation5 + $0x88] sm:$0xff]  ;;  %386 = vmatpush.xpose.msra.mxu3 %v285_v15  ;;  %v236_v20 = vld [vmem:[#allocation5 + $0x70] sm:$0xff]  ;;  %s748_s6 = scalar_lea.hbm %s747_s5, 24  ;;  %p753_p12 = scmp.lt.s32.totalorder %s747_s5, %s981_s3 }
  0x37   : > { %v283_v19 = vld [vmem:[#allocation5 + $0x1e8] sm:$0xff]  ;;  %v237_v21 = vld [vmem:[#allocation5 + $0x78] sm:$0xff]  ;;  %v280_v22 = vld [vmem:[#allocation5 + $0x1d0] sm:$0xff]  ;;  %p749_p1 = scmp.ne.s32.totalorder %s747_s5, %s748_s6  ;;  %p754_p7 = scmp.lt.s32.totalorder %s752_s18, %s748_s6 }
  0x38   : > { %v281_v23 = vld [vmem:[#allocation5 + $0x1d8] sm:$0xff]  ;;  %v234_v24 = vld [vmem:[#allocation5 + $0x60] sm:$0xff]  ;;  %v235_v25 = vld [vmem:[#allocation5 + $0x68] sm:$0xff] }
  0x39   : > { %328 = vmatpush.xpose.msra.mxu0 %v248_v4  ;;  %348 = vmatpush.xpose.msra.mxu1 %v249_v5  ;;  %v278_v26 = vld [vmem:[#allocation5 + $0x1c0] sm:$0xff]  ;;  %v279_v27 = vld [vmem:[#allocation5 + $0x1c8] sm:$0xff]  ;;  %v232_v28 = vld [vmem:[#allocation5 + $0x50] sm:$0xff]  ;;  %p750_p3 = pnand %p749_p1, %p897_p4  ;;  %p755_p8 = por %p754_p7, %p753_p12 }
  0x3a   : > { %367 = vmatpush.xpose.msra.mxu2 %v282_v16  ;;  %387 = vmatpush.xpose.msra.mxu3 %v283_v19  ;;  %v233_v29 = vld [vmem:[#allocation5 + $0x58] sm:$0xff]  ;;  %v276_v30 = vld [vmem:[#allocation5 + $0x1b0] sm:$0xff]  ;;  %v230_v32 = vld [vmem:[#allocation5 + $0x40] sm:$0xff] }
  0x3b   : > { %v277_v31 = vld [vmem:[#allocation5 + $0x1b8] sm:$0xff]  ;;  %v231_v33 = vld [vmem:[#allocation5 + $0x48] sm:$0xff]  ;;  %v274_v34 = vld [vmem:[#allocation5 + $0x1a0] sm:$0xff]  ;;  %p751_p5 = pneg %p750_p3 }
  0x3c   : > { %v275_v35 = vld [vmem:[#allocation5 + $0x1a8] sm:$0xff]  ;;  %v228_v36 = vld [vmem:[#allocation5 + $0x30] sm:$0xff]  ;;  %v229_v37 = vld [vmem:[#allocation5 + $0x38] sm:$0xff] }
  0x3d   : > { %329 = vmatpush.xpose.msra.mxu0 %v246_v6  ;;  %349 = vmatpush.xpose.msra.mxu1 %v247_v7  ;;  %v272_v38 = vld [vmem:[#allocation5 + $0x190] sm:$0xff]  ;;  %v273_v39 = vld [vmem:[#allocation5 + $0x198] sm:$0xff]  ;;  %v226_v40 = vld [vmem:[#allocation5 + $0x20] sm:$0xff]  ;;  %p756_p9 = pnand %p755_p8, %p751_p5 }
  0x3e   : > { %368 = vmatpush.xpose.msra.mxu2 %v280_v22  ;;  %388 = vmatpush.xpose.msra.mxu3 %v281_v23  ;;  %v227_v41 = vld [vmem:[#allocation5 + $0x28] sm:$0xff]  ;;  %v270_v42 = vld [vmem:[#allocation5 + $0x180] sm:$0xff]  ;;  %v224_v44 = vld [vmem:[#allocation5 + $0x10] sm:$0xff] }
  0x3f   : > { %v271_v43 = vld [vmem:[#allocation5 + $0x188] sm:$0xff]  ;;  %v225_v45 = vld [vmem:[#allocation5 + $0x18] sm:$0xff]  ;;  %v268_v46 = vld [vmem:[#allocation5 + $0x170] sm:$0xff] }
  0x40   : > { %v269_v47 = vld [vmem:[#allocation5 + $0x178] sm:$0xff]  ;;  %v222_v48 = vld [vmem:[#allocation5] sm:$0xff]  ;;  %v223_v49 = vld [vmem:[#allocation5 + $0x8] sm:$0xff] }
  0x41   : > { %330 = vmatpush.xpose.msra.mxu0 %v244_v8  ;;  %350 = vmatpush.xpose.msra.mxu1 %v245_v9  ;;  %v266_v50 = vld [vmem:[#allocation5 + $0x160] sm:$0xff]  ;;  %v316_v51 = vld [vmem:[#allocation5 + $0x2f0] sm:$0xff]  ;;  %v317_v52 = vld [vmem:[#allocation5 + $0x2f8] sm:$0xff] }
  0x42   : > { %369 = vmatpush.xpose.msra.mxu2 %v278_v26  ;;  %389 = vmatpush.xpose.msra.mxu3 %v279_v27  ;;  %v267_v53 = vld [vmem:[#allocation5 + $0x168] sm:$0xff]  ;;  %v264_v54 = vld [vmem:[#allocation5 + $0x150] sm:$0xff]  ;;  %v314_v55 = vld [vmem:[#allocation5 + $0x2e0] sm:$0xff] }
  0x43   : > { %v315_v56 = vld [vmem:[#allocation5 + $0x2e8] sm:$0xff]  ;;  %v265_v57 = vld [vmem:[#allocation5 + $0x158] sm:$0xff]  ;;  %v262_v58 = vld [vmem:[#allocation5 + $0x140] sm:$0xff] }
  0x44   : > { %v312_v59 = vld [vmem:[#allocation5 + $0x2d0] sm:$0xff]  ;;  %v313_v60 = vld [vmem:[#allocation5 + $0x2d8] sm:$0xff]  ;;  %v263_v61 = vld [vmem:[#allocation5 + $0x148] sm:$0xff] }
  0x45   : > { %331 = vmatpush.xpose.msra.mxu0 %v242_v10  ;;  %351 = vmatpush.xpose.msra.mxu1 %v243_v11  ;;  %v260_v62 = vld [vmem:[#allocation5 + $0x130] sm:$0xff]  ;;  %v310_v63 = vld [vmem:[#allocation5 + $0x2c0] sm:$0xff]  ;;  %v311_v0 = vld [vmem:[#allocation5 + $0x2c8] sm:$0xff] }
  0x46   : > { %370 = vmatpush.xpose.msra.mxu2 %v276_v30  ;;  %390 = vmatpush.xpose.msra.mxu3 %v277_v31  ;;  %v261_v1 = vld [vmem:[#allocation5 + $0x138] sm:$0xff]  ;;  %v258_v2 = vld [vmem:[#allocation5 + $0x120] sm:$0xff]  ;;  %v308_v3 = vld [vmem:[#allocation5 + $0x2b0] sm:$0xff] }
  0x47   : > { %v309_v4 = vld [vmem:[#allocation5 + $0x2b8] sm:$0xff]  ;;  %v259_v5 = vld [vmem:[#allocation5 + $0x128] sm:$0xff]  ;;  %v256_v6 = vld [vmem:[#allocation5 + $0x110] sm:$0xff] }
  0x48   : > { %v306_v7 = vld [vmem:[#allocation5 + $0x2a0] sm:$0xff]  ;;  %v307_v8 = vld [vmem:[#allocation5 + $0x2a8] sm:$0xff]  ;;  %v257_v9 = vld [vmem:[#allocation5 + $0x118] sm:$0xff] }
  0x49   : > { %332 = vmatpush.xpose.msra.mxu0 %v240_v13  ;;  %352 = vmatpush.xpose.msra.mxu1 %v241_v14  ;;  %v254_v10 = vld [vmem:[#allocation5 + $0x100] sm:$0xff]  ;;  %v304_v12 = vld [vmem:[#allocation5 + $0x290] sm:$0xff]  ;;  %v305_v13 = vld [vmem:[#allocation5 + $0x298] sm:$0xff] }
  0x4a   : > { %371 = vmatpush.xpose.msra.mxu2 %v274_v34  ;;  %391 = vmatpush.xpose.msra.mxu3 %v275_v35  ;;  %v220_v11 = vld [vmem:[%s932_s23] sm:$0xff]  ;;  %v255_v14 = vld [vmem:[#allocation5 + $0x108] sm:$0xff]  ;;  %v301_v19 = vld [vmem:[#allocation5 + $0x278] sm:$0xff] }
  0x4b   : > { %v221_v15 = vld [vmem:[%s932_s23 + $0x8] sm:$0xff]  ;;  %v302_v16 = vld [vmem:[#allocation5 + $0x280] sm:$0xff]  ;;  %v296_v22 = vld [vmem:[#allocation5 + $0x250] sm:$0xff] }
  0x4c   : > { %v297_v23 = vld [vmem:[#allocation5 + $0x258] sm:$0xff]  ;;  %v292_v26 = vld [vmem:[#allocation5 + $0x230] sm:$0xff]  ;;  %v318_v34 = vld [vmem:[#allocation7] sm:$0x7] }
  0x4d   : > { %333 = vmatpush.xpose.msra.mxu0 %v238_v17  ;;  %353 = vmatpush.xpose.msra.mxu1 %v239_v18  ;;  %v303_v17 = vld [vmem:[#allocation5 + $0x288] sm:$0xff]  ;;  %v300_v18 = vld [vmem:[#allocation5 + $0x270] sm:$0xff]  ;;  %v293_v27 = vld [vmem:[#allocation5 + $0x238] sm:$0xff]  ;;  %v320_v35 = vperm.slane %v318_v34, 0 }
  0x4e   : > { %372 = vmatpush.xpose.msra.mxu2 %v272_v38  ;;  %392 = vmatpush.xpose.msra.mxu3 %v273_v39  ;;  %v288_v30 = vld [vmem:[#allocation5 + $0x210] sm:$0xff]  ;;  %v289_v31 = vld [vmem:[#allocation5 + $0x218] sm:$0xff] }
  0x51   : > { %334 = vmatpush.xpose.msra.mxu0 %v236_v20  ;;  %354 = vmatpush.xpose.msra.mxu1 %v237_v21  ;;  %v298_v20 = vld [vmem:[#allocation5 + $0x260] sm:$0xff]  ;;  %v299_v21 = vld [vmem:[#allocation5 + $0x268] sm:$0xff] }
  0x52   : > { %373 = vmatpush.xpose.msra.mxu2 %v270_v42  ;;  %393 = vmatpush.xpose.msra.mxu3 %v271_v43 }
  0x55   : > { %335 = vmatpush.xpose.msra.mxu0 %v234_v24  ;;  %355 = vmatpush.xpose.msra.mxu1 %v235_v25  ;;  %v294_v24 = vld [vmem:[#allocation5 + $0x240] sm:$0xff]  ;;  %v295_v25 = vld [vmem:[#allocation5 + $0x248] sm:$0xff] }
  0x56   : > { %374 = vmatpush.xpose.msra.mxu2 %v268_v46  ;;  %394 = vmatpush.xpose.msra.mxu3 %v269_v47 }
  0x59   : > { %336 = vmatpush.xpose.msra.mxu0 %v232_v28  ;;  %356 = vmatpush.xpose.msra.mxu1 %v233_v29  ;;  %v290_v28 = vld [vmem:[#allocation5 + $0x220] sm:$0xff]  ;;  %v291_v29 = vld [vmem:[#allocation5 + $0x228] sm:$0xff] }
  0x5a   : > { %375 = vmatpush.xpose.msra.mxu2 %v266_v50  ;;  %395 = vmatpush.xpose.msra.mxu3 %v267_v53 }
  0x5d   : > { %337 = vmatpush.xpose.msra.mxu0 %v230_v32  ;;  %357 = vmatpush.xpose.msra.mxu1 %v231_v33  ;;  %v286_v32 = vld [vmem:[#allocation5 + $0x200] sm:$0xff]  ;;  %v287_v33 = vld [vmem:[#allocation5 + $0x208] sm:$0xff] }
  0x5e   : > { %376 = vmatpush.xpose.msra.mxu2 %v264_v54  ;;  %396 = vmatpush.xpose.msra.mxu3 %v265_v57 }
  0x61   : > { %338 = vmatpush.xpose.msra.mxu0 %v228_v36  ;;  %358 = vmatpush.xpose.msra.mxu1 %v229_v37 }
  0x62   : > { %377 = vmatpush.xpose.msra.mxu2 %v262_v58  ;;  %397 = vmatpush.xpose.msra.mxu3 %v263_v61 }
  0x65   : > { %339 = vmatpush.xpose.msra.mxu0 %v226_v40  ;;  %359 = vmatpush.xpose.msra.mxu1 %v227_v41  ;;  %v321_v40 = vperm.slane %v318_v34, 1 }
  0x66   : > { %378 = vmatpush.xpose.msra.mxu2 %v260_v62  ;;  %398 = vmatpush.xpose.msra.mxu3 %v261_v1 }
  0x69   : > { %340 = vmatpush.xpose.msra.mxu0 %v224_v44  ;;  %360 = vmatpush.xpose.msra.mxu1 %v225_v45  ;;  %v322_v45 = vperm.slane %v318_v34, 2 }
  0x6a   : > { %379 = vmatpush.xpose.msra.mxu2 %v258_v2  ;;  %399 = vmatpush.xpose.msra.mxu3 %v259_v5 }
  0x6d   : > { %341 = vmatpush.xpose.msra.mxu0 %v222_v48  ;;  %361 = vmatpush.xpose.msra.mxu1 %v223_v49 }
  0x6e   : > { %380 = vmatpush.xpose.msra.mxu2 %v256_v6  ;;  %400 = vmatpush.xpose.msra.mxu3 %v257_v9 }
  0x70   : > { %342 = vmatmul.f32.vlgmr.msra.gmra.mxu0 %v220_v11  ;;  %362 = vmatmul.f32.vlgmr.msra.gmra.mxu1 %v221_v15 }
  0x71   : > { %406 = vmatpush.xpose.msrb.mxu0 %v316_v51  ;;  %426 = vmatpush.xpose.msrb.mxu1 %v317_v52 }
  0x72   : > { %381 = vmatpush.xpose.msra.mxu2 %v254_v10  ;;  %401 = vmatpush.xpose.msra.mxu3 %v255_v14 }
  0x75   : > { %407 = vmatpush.xpose.msrb.mxu0 %v314_v55  ;;  %427 = vmatpush.xpose.msrb.mxu1 %v315_v56 }
  0x76   : > { %382 = vmatmul.f32.vlgmr.msra.gmra.mxu2 %v220_v11  ;;  %402 = vmatmul.f32.vlgmr.msra.gmra.mxu3 %v221_v15 }
  0x79   : > { %408 = vmatpush.xpose.msrb.mxu0 %v312_v59  ;;  %428 = vmatpush.xpose.msrb.mxu1 %v313_v60 }
  0x7d   : > { %409 = vmatpush.xpose.msrb.mxu0 %v310_v63  ;;  %429 = vmatpush.xpose.msrb.mxu1 %v311_v0 }
  0x81   : > { %410 = vmatpush.xpose.msrb.mxu0 %v308_v3  ;;  %430 = vmatpush.xpose.msrb.mxu1 %v309_v4 }
  0x85   : > { %411 = vmatpush.xpose.msrb.mxu0 %v306_v7  ;;  %431 = vmatpush.xpose.msrb.mxu1 %v307_v8 }
  0x89   : > { %412 = vmatpush.xpose.msrb.mxu0 %v304_v12  ;;  %432 = vmatpush.xpose.msrb.mxu1 %v305_v13 }
  0x8d   : > { %413 = vmatpush.xpose.msrb.mxu0 %v302_v16  ;;  %433 = vmatpush.xpose.msrb.mxu1 %v303_v17 }
  0x91   : > { %414 = vmatpush.xpose.msrb.mxu0 %v300_v18  ;;  %434 = vmatpush.xpose.msrb.mxu1 %v301_v19 }
  0x95   : > { %415 = vmatpush.xpose.msrb.mxu0 %v298_v20  ;;  %435 = vmatpush.xpose.msrb.mxu1 %v299_v21 }
  0x99   : > { %416 = vmatpush.xpose.msrb.mxu0 %v296_v22  ;;  %436 = vmatpush.xpose.msrb.mxu1 %v297_v23 }
  0x9d   : > { %417 = vmatpush.xpose.msrb.mxu0 %v294_v24  ;;  %437 = vmatpush.xpose.msrb.mxu1 %v295_v25 }
  0xa1   : > { %418 = vmatpush.xpose.msrb.mxu0 %v292_v26  ;;  %438 = vmatpush.xpose.msrb.mxu1 %v293_v27 }
  0xa5   : > { %419 = vmatpush.xpose.msrb.mxu0 %v290_v28  ;;  %439 = vmatpush.xpose.msrb.mxu1 %v291_v29 }
  0xa9   : > { %420 = vmatpush.xpose.msrb.mxu0 %v288_v30  ;;  %440 = vmatpush.xpose.msrb.mxu1 %v289_v31 }
  0xad   : > { %421 = vmatpush.xpose.msrb.mxu0 %v286_v32  ;;  %441 = vmatpush.xpose.msrb.mxu1 %v287_v33 }
  0xb0   : > { %422 = vmatmul.f32.vlgmr.msrb.gmra.mxu0 %v220_v11  ;;  %442 = vmatmul.f32.vlgmr.msrb.gmra.mxu1 %v221_v15 }
  0xed   : > { %v343_v36 = vpop.f32.mrf.mxu0  ;;  %v363_v38 = vpop.f32.mrf.mxu1 }
  0xee   : > { %v344_v37 = vadd.f32 %v343_v36, %v320_v35 }
  0xf0   : > { %v364_v39 = vadd.f32 %v363_v38, %v344_v37 }
  0xf2   : > { %446 = vst [vmem:[%s219_s9] sm:$0xff] %v364_v39 }
  0xf9   : > { %v383_v41 = vpop.f32.mrf.mxu2  ;;  %v403_v43 = vpop.f32.mrf.mxu3 }
  0xfa   : > { %v384_v42 = vadd.f32 %v383_v41, %v321_v40 }
  0xfc   : > { %v404_v44 = vadd.f32 %v403_v43, %v384_v42 }
  0xfe   : > { %447 = vst [vmem:[%s219_s9 + $0x8] sm:$0xff] %v404_v44 }
 0x12d   : > { %v423_v46 = vpop.f32.mrf.mxu0  ;;  %v443_v47 = vpop.f32.mrf.mxu1 }
 0x12e   : > { %v424_v48 = vadd.f32 %v423_v46, %v322_v45 }
 0x130   : > { %v444_v49 = vadd.f32 %v443_v47, %v424_v48 }
 0x132   : > { %448 = vst [vmem:[%s219_s9 + $0x10] sm:$0xff] %v444_v49 }
 0x133   : > { %759 = shalt.err (!%p756_p9)
}
 0x134   : > { %583 = dma.vmem_to_hbm [thread:$0]  (%p897_p4), %s464_s28, 384, %s466_s29, %s450_s30  }
 0x135 PF: > { %s477_s10 = sand.u32 1, %s790_s12   ;;  %p988_p10 = scmp.ge.s32.totalorder %s802_s15, 2 }
 0x136   : > { %s478_s22 = scalar_lea.sflag [#allocation4], %s477_s10 }
 0x137   : > { %p597_p13 = pnand %p988_p10, %p901_p6 }
 0x139   : > { %p598_p11 = pneg %p597_p13 }
 0x13b   : > { %785 = dma.done.wait (%p598_p11), %s478_s22, 384  }
 0x13c   : > { %787 = vsyncadd (%p598_p11), %s478_s22, 4294966912  ;;  %p17_p0 = scmp.ge.s32.totalorder %s871_s4, 4   ;;  %s989_s12 = smov %s794_s13 }
 0x13d   : > { %s990_s13 = smov %s798_s14  ;;  %s991_s14 = smov %s882_s7 }
 0x13e   : > { %s992_s15 = smov %s871_s4  ;;  %19 = sbr.rel (!%p17_p0) target bundleno = 6 (0x6), region = 85 }
 0x143   :  { %484 = vsyncpa [#allocation3], 1 }
 0x144   :  { %486 = vsyncpa [#allocation3 + $0x1], 1 }
 0x145   :  { %487 = vsyncpa [#allocation6], 1 }
 0x146   :  { %488 = vsyncpa [#allocation4], 1 }
 0x147   :  { %490 = vsyncpa [#allocation4 + $0x1], 1 }

</bundles_post_ra>
